<compile_context>
chip_gen: v7x
topology: tpu7x:2x2x1
jax: 0.10.0
libtpu: 0.0.40
codegen_flags: <defaults>
</compile_context>

<pallas_src>
import functools

import jax
import jax.numpy as jnp
from jax import lax
from jax.experimental import pallas as pl
from jax.experimental.pallas import tpu as pltpu


def _bce_dice_kernel(x_ref, t_ref, out_ref,
                     bce_acc, inter_acc, st_acc,
                     *, valid_elems, tiles_valid, tile_rows, lanes, needs_mask):
    # x_ref / t_ref: (TR, 128) block of one sample's flattened features.
    # out_ref: (3, 128) per-(sample, chunk) lane partials
    #          rows = [bce_sum, intersection, sigmoid_sum + target_sum].
    k = pl.program_id(2)
    kp = pl.num_programs(2)
    tile_idx = pl.program_id(1) * kp + k          # global row-tile index

    @pl.when(k == 0)
    def _():
        bce_acc[...] = jnp.zeros_like(bce_acc)
        inter_acc[...] = jnp.zeros_like(inter_acc)
        st_acc[...] = jnp.zeros_like(st_acc)

    def fold(v):
        # (TR, 128) -> (8, 128) with VPU adds only; the reshape stays within
        # (8,128) tile boundaries so it lowers to in-vreg accumulation.
        return jnp.sum(v.reshape(tile_rows // 8, 8, lanes), axis=0)

    def accumulate(x, t):
        # One exp per element, reused by both the stable BCE term and sigmoid:
        #   bce     = max(x, 0) - x*t + log1p(exp(-|x|))
        #   sigmoid = 1/(1+e) if x >= 0 else e/(1+e),   e = exp(-|x|)
        e = jnp.exp(-jnp.abs(x))
        bce = jnp.maximum(x, 0.0) - x * t + jnp.log1p(e)
        inv = pl.reciprocal(1.0 + e, approx=True)   # EUP approx, no NR refine
        sig = jnp.where(x >= 0.0, inv, e * inv)
        bce_acc[...] += fold(bce)
        inter_acc[...] += fold(sig * t)
        st_acc[...] += fold(sig + t)

    x_raw = x_ref[...].astype(jnp.float32)
    t_raw = t_ref[...].astype(jnp.float32)

    if needs_mask:
        # Fast path: interior tiles are fully valid.
        @pl.when(tile_idx < tiles_valid - 1)
        def _():
            accumulate(x_raw, t_raw)

        # Boundary (or fully out-of-range) tiles: sanitize undefined elements
        # BEFORE any transcendental.  x -> -1e4 gives exp(-|x|) == 0 exactly,
        # so masked elements contribute exactly zero to every sum.
        @pl.when(tile_idx >= tiles_valid - 1)
        def _():
            row = lax.broadcasted_iota(jnp.int32, (tile_rows, lanes), 0)
            lane = lax.broadcasted_iota(jnp.int32, (tile_rows, lanes), 1)
            flat = tile_idx * (tile_rows * lanes) + row * lanes + lane
            valid = flat < valid_elems
            accumulate(jnp.where(valid, x_raw, -1e4),
                       jnp.where(valid, t_raw, 0.0))
    else:
        accumulate(x_raw, t_raw)

    @pl.when(k == kp - 1)
    def _():
        # Direct row writes (no concatenate); one XLU sublane-reduction per
        # accumulator, once per (sample, chunk).
        out_ref[0:1, :] = jnp.sum(bce_acc[...], axis=0, keepdims=True)
        out_ref[1:2, :] = jnp.sum(inter_acc[...], axis=0, keepdims=True)
        out_ref[2:3, :] = jnp.sum(st_acc[...], axis=0, keepdims=True)


def bce_dice_loss(logits, target, *, smooth=1e-05):
    """logits, target: (N, ...) arrays (any float dtype). Returns scalar f32."""
    N = logits.shape[0]
    D = 1
    for d in logits.shape[1:]:
        D *= d

    x2 = logits.reshape(N, D)
    t2 = target.reshape(N, D)

    L = 128
    r = -(-D // L)                                 # 128-lane rows per sample
    if r * L != D:
        # Lane-tail pad only (< 128 elems/sample of extra data); pad values
        # are irrelevant because the kernel masks by flat element index.
        pad = r * L - D
        x2 = jnp.pad(x2, ((0, 0), (0, pad)))
        t2 = jnp.pad(t2, ((0, 0), (0, pad)))
    x3 = x2.reshape(N, r, L)
    t3 = t2.reshape(N, r, L)

    # Rows per block: multiple of the dtype sublane tile, capped at 1024
    # (>= ~85% of HBM roofline; larger only adds VMEM pressure).
    itemsize = max(jnp.dtype(logits.dtype).itemsize,
                   jnp.dtype(target.dtype).itemsize)
    sub = {4: 8, 2: 16, 1: 32}.get(itemsize, 8)
    TR = min(1024, -(-r // sub) * sub)
    kt = -(-r // TR)                               # valid row tiles per sample

    # v7x: guarantee >= 2 balanced blocks on the parallel axes when N < 2.
    P = 2 if (N < 2 and kt >= 2) else 1
    Kp = -(-kt // P)                               # row tiles per chunk

    # Mask only needed if the tile span overshoots D (row tail, lane tail, or
    # chunk-padding tiles).
    needs_mask = (P * Kp * TR * L != D)

    def in_map(n, p, k):
        # Clamp so chunk-padding tiles re-read the last valid tile (their
        # contribution is fully masked in-kernel).
        return (n, jnp.minimum(p * Kp + k, kt - 1), 0)

    cost = pl.CostEstimate(
        flops=14 * N * D,
        transcendentals=3 * N * D,
        bytes_accessed=N * D * (jnp.dtype(logits.dtype).itemsize
                                + jnp.dtype(target.dtype).itemsize)
                       + N * P * 3 * L * 4,
    )

    kernel = functools.partial(
        _bce_dice_kernel,
        valid_elems=D, tiles_valid=kt, tile_rows=TR, lanes=L,
        needs_mask=needs_mask)

    partials = pl.pallas_call(
        kernel,
        out_shape=jax.ShapeDtypeStruct((N, P, 3, L), jnp.float32),
        grid_spec=pltpu.PrefetchScalarGridSpec(
            num_scalar_prefetch=0,
            grid=(N, P, Kp),
            in_specs=[
                pl.BlockSpec((None, TR, L), in_map),
                pl.BlockSpec((None, TR, L), in_map),
            ],
            out_specs=pl.BlockSpec((None, None, 3, L),
                                   lambda n, p, k: (n, p, 0, 0)),
            scratch_shapes=[
                pltpu.VMEM((8, L), jnp.float32),   # bce lane partials
                pltpu.VMEM((8, L), jnp.float32),   # sigmoid*target partials
                pltpu.VMEM((8, L), jnp.float32),   # sigmoid+target partials
            ],
        ),
        compiler_params=pltpu.CompilerParams(
            dimension_semantics=("parallel", "parallel", "arbitrary")),
        cost_estimate=cost,
    )(x3, t3)

    # Tiny final combine (N*P*3*128 elements) in plain JAX.
    sums = jnp.sum(partials, axis=(1, 3))                      # (N, 3)
    bce_mean = jnp.sum(sums[:, 0]) / float(N * D)
    inter, st = sums[:, 1], sums[:, 2]
    dice = (2.0 * inter + smooth) / (st + smooth)              # (N,)
    dice_loss = 1.0 - jnp.sum(dice) / N
    return 0.5 * bce_mean + dice_loss


def _reference(logits, target):
    x = logits.astype(jnp.float32)
    t = target.astype(jnp.float32)
    bce = jnp.mean(jnp.maximum(x, 0.0) - x * t + jnp.log1p(jnp.exp(-jnp.abs(x))))
    smooth = 1e-05
    n = x.shape[0]
    s = jax.nn.sigmoid(x).reshape(n, -1)
    t2 = t.reshape(n, -1)
    inter = jnp.sum(s * t2, axis=1)
    dice = (2.0 * inter + smooth) / (jnp.sum(s, axis=1) + jnp.sum(t2, axis=1) + smooth)
    dice = 1.0 - jnp.sum(dice) / n
    return 0.5 * bce + dice


if __name__ == "__main__":
    key = jax.random.PRNGKey(0)
    k1, k2 = jax.random.split(key)
    # small segmentation-style shapes: N=2, C=4, H=W=16
    logits = jax.random.normal(k1, (2, 4, 16, 16), dtype=jnp.float32)
    target = (jax.random.uniform(k2, (2, 4, 16, 16)) > 0.5).astype(jnp.float32)

    loss = jax.block_until_ready(bce_dice_loss(logits, target))
    ref = jax.block_until_ready(_reference(logits, target))
    # Tolerance accounts for pl.reciprocal(approx=True) used for the dice
    # sigmoid (raw EUP reciprocal, no Newton refinement); BCE term is exact.
    assert jnp.allclose(loss, ref, rtol=2e-3, atol=2e-3), (loss, ref)
    print("KERNEL_OK")
</pallas_src>

<mosaic_0001>
module attributes {stable_mosaic.version = 11 : i64} {
  func.func @_bce_dice_kernel(%arg0: i32, %arg1: i32, %arg2: i32, %arg3: memref<1x8x128xf32, #tpu.memory_space<vmem>>, %arg4: memref<1x8x128xf32, #tpu.memory_space<vmem>>, %arg5: memref<1x1x3x128xf32, #tpu.memory_space<vmem>>, %arg6: memref<8x128xf32, #tpu.memory_space<vmem>>, %arg7: memref<8x128xf32, #tpu.memory_space<vmem>>, %arg8: memref<8x128xf32, #tpu.memory_space<vmem>>) attributes {dimension_semantics = [#tpu.dimension_semantics<parallel>, #tpu.dimension_semantics<parallel>, #tpu.dimension_semantics<arbitrary>], iteration_bounds = array<i64: 2, 1, 1>, scalar_prefetch = 0 : i64, scratch_operands = 3 : i64, tpu.core_type = #tpu.core_type<tc>, window_params = [{transform_indices = @transform_0, window_bounds = array<i64: 1, 8, 128>}, {transform_indices = @transform_1, window_bounds = array<i64: 1, 8, 128>}, {transform_indices = @transform_2, window_bounds = array<i64: 1, 1, 3, 128>}]} {
    %c0_i32 = arith.constant 0 : i32
    %0 = arith.cmpi eq, %arg2, %c0_i32 : i32
    %1 = arith.extui %0 : i1 to i32
    %c0_i32_0 = arith.constant 0 : i32
    %2 = arith.cmpi ne, %1, %c0_i32_0 : i32
    scf.if %2 {
      %cst_26 = arith.constant 0.000000e+00 : f32
      %44 = vector.broadcast %cst_26 : f32 to vector<8x128xf32>
      %c0_27 = arith.constant 0 : index
      %c0_28 = arith.constant 0 : index
      %45 = vector.load %arg6[%c0_27, %c0_28] : memref<8x128xf32, #tpu.memory_space<vmem>>, vector<8x128xf32>
      tpu.vector_store %arg6[%c0_27, %c0_28], %44 {strides = array<i32>} : memref<8x128xf32, #tpu.memory_space<vmem>>, vector<8x128xf32>,
      %cst_29 = arith.constant 0.000000e+00 : f32
      %46 = vector.broadcast %cst_29 : f32 to vector<8x128xf32>
      %c0_30 = arith.constant 0 : index
      %c0_31 = arith.constant 0 : index
      %47 = vector.load %arg7[%c0_30, %c0_31] : memref<8x128xf32, #tpu.memory_space<vmem>>, vector<8x128xf32>
      tpu.vector_store %arg7[%c0_30, %c0_31], %46 {strides = array<i32>} : memref<8x128xf32, #tpu.memory_space<vmem>>, vector<8x128xf32>,
      %cst_32 = arith.constant 0.000000e+00 : f32
      %48 = vector.broadcast %cst_32 : f32 to vector<8x128xf32>
      %c0_33 = arith.constant 0 : index
      %c0_34 = arith.constant 0 : index
      %49 = vector.load %arg8[%c0_33, %c0_34] : memref<8x128xf32, #tpu.memory_space<vmem>>, vector<8x128xf32>
      tpu.vector_store %arg8[%c0_33, %c0_34], %48 {strides = array<i32>} : memref<8x128xf32, #tpu.memory_space<vmem>>, vector<8x128xf32>,
    } else {
    }
    %c0 = arith.constant 0 : index
    %c0_1 = arith.constant 0 : index
    %c0_2 = arith.constant 0 : index
    %3 = vector.load %arg3[%c0, %c0_1, %c0_2] : memref<1x8x128xf32, #tpu.memory_space<vmem>>, vector<1x8x128xf32>
    %4 = vector.shape_cast %3 : vector<1x8x128xf32> to vector<8x128xf32>
    %c0_3 = arith.constant 0 : index
    %c0_4 = arith.constant 0 : index
    %c0_5 = arith.constant 0 : index
    %5 = vector.load %arg4[%c0_3, %c0_4, %c0_5] : memref<1x8x128xf32, #tpu.memory_space<vmem>>, vector<1x8x128xf32>
    %6 = vector.shape_cast %5 : vector<1x8x128xf32> to vector<8x128xf32>
    %7 = math.absf %4 : vector<8x128xf32>
    %cst = arith.constant 0.000000e+00 : f32
    %8 = vector.broadcast %cst : f32 to vector<8x128xf32>
    %9 = arith.subf %8, %7 : vector<8x128xf32>
    %10 = math.exp %9 : vector<8x128xf32>
    %cst_6 = arith.constant 0.000000e+00 : f32
    %11 = vector.broadcast %cst_6 : f32 to vector<8x128xf32>
    %12 = arith.maximumf %4, %11 : vector<8x128xf32>
    %13 = arith.mulf %4, %6 : vector<8x128xf32>
    %14 = arith.subf %12, %13 : vector<8x128xf32>
    %15 = math.log1p %10 : vector<8x128xf32>
    %16 = arith.addf %14, %15 : vector<8x128xf32>
    %cst_7 = arith.constant 1.000000e+00 : f32
    %17 = vector.broadcast %cst_7 : f32 to vector<8x128xf32>
    %18 = arith.addf %17, %10 : vector<8x128xf32>
    %19 = tpu.reciprocal %18 {approx = true} : vector<8x128xf32> -> vector<8x128xf32>
    %cst_8 = arith.constant 0.000000e+00 : f32
    %20 = vector.broadcast %cst_8 : f32 to vector<8x128xf32>
    %21 = arith.cmpf oge, %4, %20 : vector<8x128xf32>
    %22 = arith.mulf %10, %19 : vector<8x128xf32>
    %23 = arith.select %21, %19, %22 : vector<8x128xi1>, vector<8x128xf32>
    %c0_9 = arith.constant 0 : index
    %c0_10 = arith.constant 0 : index
    %24 = vector.load %arg6[%c0_9, %c0_10] : memref<8x128xf32, #tpu.memory_space<vmem>>, vector<8x128xf32>
    %25 = vector.shape_cast %16 : vector<8x128xf32> to vector<1x8x128xf32>
    %cst_11 = arith.constant dense<0.000000e+00> : vector<8x128xf32>
    %26 = vector.multi_reduction <add>, %25, %cst_11 [0] : vector<1x8x128xf32> to vector<8x128xf32>
    %27 = arith.addf %24, %26 : vector<8x128xf32>
    %c0_12 = arith.constant 0 : index
    %c0_13 = arith.constant 0 : index
    %28 = vector.load %arg6[%c0_12, %c0_13] : memref<8x128xf32, #tpu.memory_space<vmem>>, vector<8x128xf32>
    tpu.vector_store %arg6[%c0_12, %c0_13], %27 {strides = array<i32>} : memref<8x128xf32, #tpu.memory_space<vmem>>, vector<8x128xf32>,
    %c0_14 = arith.constant 0 : index
    %c0_15 = arith.constant 0 : index
    %29 = vector.load %arg7[%c0_14, %c0_15] : memref<8x128xf32, #tpu.memory_space<vmem>>, vector<8x128xf32>
    %30 = arith.mulf %23, %6 : vector<8x128xf32>
    %31 = vector.shape_cast %30 : vector<8x128xf32> to vector<1x8x128xf32>
    %cst_16 = arith.constant dense<0.000000e+00> : vector<8x128xf32>
    %32 = vector.multi_reduction <add>, %31, %cst_16 [0] : vector<1x8x128xf32> to vector<8x128xf32>
    %33 = arith.addf %29, %32 : vector<8x128xf32>
    %c0_17 = arith.constant 0 : index
    %c0_18 = arith.constant 0 : index
    %34 = vector.load %arg7[%c0_17, %c0_18] : memref<8x128xf32, #tpu.memory_space<vmem>>, vector<8x128xf32>
    tpu.vector_store %arg7[%c0_17, %c0_18], %33 {strides = array<i32>} : memref<8x128xf32, #tpu.memory_space<vmem>>, vector<8x128xf32>,
    %c0_19 = arith.constant 0 : index
    %c0_20 = arith.constant 0 : index
    %35 = vector.load %arg8[%c0_19, %c0_20] : memref<8x128xf32, #tpu.memory_space<vmem>>, vector<8x128xf32>
    %36 = arith.addf %23, %6 : vector<8x128xf32>
    %37 = vector.shape_cast %36 : vector<8x128xf32> to vector<1x8x128xf32>
    %cst_21 = arith.constant dense<0.000000e+00> : vector<8x128xf32>
    %38 = vector.multi_reduction <add>, %37, %cst_21 [0] : vector<1x8x128xf32> to vector<8x128xf32>
    %39 = arith.addf %35, %38 : vector<8x128xf32>
    %c0_22 = arith.constant 0 : index
    %c0_23 = arith.constant 0 : index
    %40 = vector.load %arg8[%c0_22, %c0_23] : memref<8x128xf32, #tpu.memory_space<vmem>>, vector<8x128xf32>
    tpu.vector_store %arg8[%c0_22, %c0_23], %39 {strides = array<i32>} : memref<8x128xf32, #tpu.memory_space<vmem>>, vector<8x128xf32>,
    %c0_i32_24 = arith.constant 0 : i32
    %41 = arith.cmpi eq, %arg2, %c0_i32_24 : i32
    %42 = arith.extui %41 : i1 to i32
    %c0_i32_25 = arith.constant 0 : i32
    %43 = arith.cmpi ne, %42, %c0_i32_25 : i32
    scf.if %43 {
      %c0_26 = arith.constant 0 : index
      %c0_27 = arith.constant 0 : index
      %44 = vector.load %arg6[%c0_26, %c0_27] : memref<8x128xf32, #tpu.memory_space<vmem>>, vector<8x128xf32>
      %cst_28 = arith.constant dense<0.000000e+00> : vector<128xf32>
      %45 = vector.multi_reduction <add>, %44, %cst_28 [0] : vector<8x128xf32> to vector<128xf32>
      %46 = vector.shape_cast %45 : vector<128xf32> to vector<1x128xf32>
      %c0_29 = arith.constant 0 : index
      %c0_30 = arith.constant 0 : index
      %c0_31 = arith.constant 0 : index
      %c0_32 = arith.constant 0 : index
      %47 = vector.load %arg5[%c0_29, %c0_30, %c0_31, %c0_32] : memref<1x1x3x128xf32, #tpu.memory_space<vmem>>, vector<1x1x1x128xf32>
      %48 = vector.shape_cast %47 : vector<1x1x1x128xf32> to vector<1x128xf32>
      %49 = vector.shape_cast %46 : vector<1x128xf32> to vector<1x1x1x128xf32>
      tpu.vector_store %arg5[%c0_29, %c0_30, %c0_31, %c0_32], %49 {strides = array<i32>} : memref<1x1x3x128xf32, #tpu.memory_space<vmem>>, vector<1x1x1x128xf32>,
      %c0_33 = arith.constant 0 : index
      %c0_34 = arith.constant 0 : index
      %50 = vector.load %arg7[%c0_33, %c0_34] : memref<8x128xf32, #tpu.memory_space<vmem>>, vector<8x128xf32>
      %cst_35 = arith.constant dense<0.000000e+00> : vector<128xf32>
      %51 = vector.multi_reduction <add>, %50, %cst_35 [0] : vector<8x128xf32> to vector<128xf32>
      %52 = vector.shape_cast %51 : vector<128xf32> to vector<1x128xf32>
      %c0_36 = arith.constant 0 : index
      %c0_37 = arith.constant 0 : index
      %c1 = arith.constant 1 : index
      %c0_38 = arith.constant 0 : index
      %53 = vector.load %arg5[%c0_36, %c0_37, %c1, %c0_38] : memref<1x1x3x128xf32, #tpu.memory_space<vmem>>, vector<1x1x1x128xf32>
      %54 = vector.shape_cast %53 : vector<1x1x1x128xf32> to vector<1x128xf32>
      %55 = vector.shape_cast %52 : vector<1x128xf32> to vector<1x1x1x128xf32>
      tpu.vector_store %arg5[%c0_36, %c0_37, %c1, %c0_38], %55 {strides = array<i32>} : memref<1x1x3x128xf32, #tpu.memory_space<vmem>>, vector<1x1x1x128xf32>,
      %c0_39 = arith.constant 0 : index
      %c0_40 = arith.constant 0 : index
      %56 = vector.load %arg8[%c0_39, %c0_40] : memref<8x128xf32, #tpu.memory_space<vmem>>, vector<8x128xf32>
      %cst_41 = arith.constant dense<0.000000e+00> : vector<128xf32>
      %57 = vector.multi_reduction <add>, %56, %cst_41 [0] : vector<8x128xf32> to vector<128xf32>
      %58 = vector.shape_cast %57 : vector<128xf32> to vector<1x128xf32>
      %c0_42 = arith.constant 0 : index
      %c0_43 = arith.constant 0 : index
      %c2 = arith.constant 2 : index
      %c0_44 = arith.constant 0 : index
      %59 = vector.load %arg5[%c0_42, %c0_43, %c2, %c0_44] : memref<1x1x3x128xf32, #tpu.memory_space<vmem>>, vector<1x1x1x128xf32>
      %60 = vector.shape_cast %59 : vector<1x1x1x128xf32> to vector<1x128xf32>
      %61 = vector.shape_cast %58 : vector<1x128xf32> to vector<1x1x1x128xf32>
      tpu.vector_store %arg5[%c0_42, %c0_43, %c2, %c0_44], %61 {strides = array<i32>} : memref<1x1x3x128xf32, #tpu.memory_space<vmem>>, vector<1x1x1x128xf32>,
    } else {
    }
    return
  }
  func.func @transform_0(%arg0: i32, %arg1: i32, %arg2: i32) -> (i32, i32, i32) {
    %c1_i32 = arith.constant 1 : i32
    %0 = arith.muli %arg1, %c1_i32 : i32
    %1 = arith.addi %0, %arg2 : i32
    %c0_i32 = arith.constant 0 : i32
    %2 = arith.minsi %1, %c0_i32 : i32
    %c0_i32_0 = arith.constant 0 : i32
    %c0_i32_1 = arith.constant 0 : i32
    return %arg0, %2, %c0_i32_0 : i32, i32, i32
  }
  func.func @transform_1(%arg0: i32, %arg1: i32, %arg2: i32) -> (i32, i32, i32) {
    %c1_i32 = arith.constant 1 : i32
    %0 = arith.muli %arg1, %c1_i32 : i32
    %1 = arith.addi %0, %arg2 : i32
    %c0_i32 = arith.constant 0 : i32
    %2 = arith.minsi %1, %c0_i32 : i32
    %c0_i32_0 = arith.constant 0 : i32
    %c0_i32_1 = arith.constant 0 : i32
    return %arg0, %2, %c0_i32_0 : i32, i32, i32
  }
  func.func @transform_2(%arg0: i32, %arg1: i32, %arg2: i32) -> (i32, i32, i32, i32) {
    %c0_i32 = arith.constant 0 : i32
    %c0_i32_0 = arith.constant 0 : i32
    %c0_i32_1 = arith.constant 0 : i32
    return %arg0, %arg1, %c0_i32, %c0_i32_0 : i32, i32, i32, i32
  }
}

</mosaic_0001>

<bundles_post_ra>
// kernel: tpu_custom_call.1
= control target key start
LH: loop header
LB: loop body
LE: loop exit
PB: predicated region body
PF: predicated region fallthrough
CT: control target
= control target key end

     0   :  { %7 = vsyncpa [#allocation6], 0  ;;  %s821_s0 = inlined_call_operand.hbm [shape: f32[2,8,128], index: 0, kind: input, shape index: {}]   ;;  %s822_s1 = inlined_call_operand.hbm [shape: f32[2,8,128], index: 1, kind: input, shape index: {}]   ;;  %s823_s2 = inlined_call_operand.vmem [shape: f32[2,1,3,128], index: 2, kind: output, shape index: {}]  }
   0x1   :  { %9 = vsyncpa [#allocation6 + $0x1], 0 }
   0x2   :  { %10 = vsyncpa [#allocation8], 0 }
   0x3   :  { %12 = vsyncpa [#allocation8 + $0x1], 0  ;;  %s649_s9 = smov 0   ;;  %s651_s10 = smov 0  }
   0x4   :  { %s653_s11 = smov 0   ;;  %s655_s12 = smov 0  }
   0x5   :  { %s657_s13 = smov 0   ;;  %s659_s14 = smov 0  }
   0x6 LB: > { %s436_s15 = sadd.s32 4294967295, %s630_s14   ;;  %s37_s16 = sadd.s32 1, %s626_s13  ;;  %s630_s14 = sphi %s659_s14, %s18_s14   ;;  %s626_s13 = sphi %s657_s13, %s837_s13   ;;  %s622_s12 = sphi %s655_s12, %s836_s12   ;;  %s618_s11 = sphi %s653_s11, %s835_s11   ;;  %s614_s10 = sphi %s651_s10, %s834_s10   ;;  %s610_s9 = sphi %s649_s9, %s833_s9  }
   0x7   : > { %p39_p0 = scmp.ge.s32.totalorder %s37_s16, 2  ;;  %s52_s17 = sadd.s32 1, %s618_s11 }
   0x8   : > { %p59_p1 = scmp.ne.s32.totalorder %s618_s11, %s614_s10  ;;  %p60_p2 = scmp.eq.s32.totalorder %s630_s14, 0 }
   0x9   : > { %s839_s16 = smov (%p39_p0, %s37_s16), 0  ;;  %p65_p4 = scmp.ne.s32.totalorder %s614_s10, %s610_s9 }
   0xa   : > { %p685_p3 = por %p60_p2, %p59_p1  ;;  %s47_s19 = ssub.s32 %s626_s13, %s839_s16 }
   0xb   : > { %p66_p5 = scmp.eq.s32.totalorder %s436_s15, 0  ;;  %p50_p6 = scmp.eq.s32.totalorder %s47_s19, 0 }
   0xc   : > { %p461_p8 = scmp.lt.s32.totalorder %s630_s14, 2  ;;  %s701_s22 = sand.u32 1, %s618_s11  }
   0xd   : > { %p692_p7 = por %p66_p5, %p65_p4  ;;  %s441_s23 = sshll.u32 %s626_s13, 7 }
   0xe   : > { %s698_s21 = scalar_select %p50_p6, %s618_s11, %s52_s17  }
   0xf   : > { %s826_s20 = scalar_select %p692_p7, 1, 0 }
  0x10   : > { %s440_s24 = sshll.u32 %s701_s22, 3  ;;  %s710_s27 = scalar_lea.hbm %s821_s0, %s441_s23 }
  0x11   : > { %s155_s28 = scalar_lea.vmem [#allocation5], %s440_s24  ;;  %p716_p9 = pnand %p461_p8, %p685_p3 }
  0x12   : > { %s166_s29 = sshll.u32 %s155_s28, 4  ;;  %s152_s3 = scalar_lea.sflag [#allocation6], %s701_s22  ;;  %s720_s29 = int_to_ptr.vmem [resolvable:$true] %s166_s29 }
  0x13   : > { %s516_s4 = scalar_lea.hbm %s710_s27, 128  ;;  %p518_p13 = pneg %p716_p9 }
  0x14   : > { %p517_p12 = scmp.ne.s32.totalorder %s710_s27, %s516_s4  ;;  %s521_s7 = scalar_lea.hbm %s821_s0, 256 }
  0x15   : > { %p522_p2 = scmp.lt.u32.totalorder %s710_s27, %s821_s0  ;;  %p523_p3 = scmp.lt.u32.totalorder %s521_s7, %s516_s4 }
  0x16   : > { %p519_p0 = pnand %p518_p13, %p517_p12  ;;  %p525_p5 = scmp.lt.u32.totalorder %s516_s4, %s710_s27 }
  0x17   : > { %p524_p4 = por %p523_p3, %p522_p2 }
  0x18   : > { %p520_p1 = pneg %p519_p0 }
  0x19   : > { %p526_p6 = por %p525_p5, %p524_p4 }
  0x1b   : > { %p527_p8 = pnand %p526_p6, %p520_p1 }
  0x1d   : > { %530 = shalt.err (!%p527_p8)
}
  0x1e   : > { %s531_s15 = scalar_lea.vmem %s720_s29, 128  ;;  %s632_s17 = smov [#allocation5]  }
  0x1f   : > { %p532_p12 = scmp.ne.s32.totalorder %s720_s29, %s531_s15  ;;  %s536_s18 = sshll.u32 %s632_s17, 4  ;;  %s537_s18 = int_to_ptr.vmem [resolvable:$false] %s536_s18 }
  0x20   : > { %s538_s19 = scalar_lea.vmem %s537_s18, 256  ;;  %p539_p11 = scmp.lt.s32.totalorder %s720_s29, %s537_s18 }
  0x21   : > { %p534_p0 = pnand %p532_p12, %p518_p13  ;;  %p540_p2 = scmp.lt.s32.totalorder %s538_s19, %s531_s15 }
  0x23   : > { %p535_p10 = pneg %p534_p0  ;;  %p541_p3 = por %p540_p2, %p539_p11 }
  0x25   : > { %p542_p4 = pnand %p541_p3, %p535_p10 }
  0x27   : > { %545 = shalt.err (!%p542_p4)
}
  0x28   : > { %457 = dma.hbm_to_vmem [thread:$0]  (!%p716_p9), %s710_s27, 128, %s720_s29, %s152_s3  }
  0x29   : > { %p828_p1 = scmp.lt.s32.totalorder %s630_s14, 3  ;;  %p829_p5 = scmp.ge.s32.totalorder %s630_s14, 1 }
  0x2a   : > { %s763_s4 = scalar_lea.hbm %s822_s1, %s441_s23  ;;  %s177_s5 = scalar_lea.vmem [#allocation7], %s440_s24 }
  0x2b   : > { %p754_p6 = pnand %p829_p5, %p828_p1  ;;  %s188_s6 = sshll.u32 %s177_s5, 4  ;;  %s189_s6 = int_to_ptr.vmem [resolvable:$true] %s188_s6 }
  0x2c   : > { %s174_s27 = scalar_lea.sflag [#allocation8], %s701_s22  ;;  %s546_s29 = scalar_lea.hbm %s763_s4, 128 }
  0x2d   : > { %s830_s25 = scalar_select %p754_p6, 1, 0 }
  0x2e   : > { %p547_p10 = scmp.ne.s32.totalorder %s763_s4, %s546_s29  ;;  %s551_s23 = scalar_lea.hbm %s822_s1, 256 }
  0x2f   : > { %p552_p12 = scmp.lt.u32.totalorder %s763_s4, %s822_s1  ;;  %p553_p0 = scmp.lt.u32.totalorder %s551_s23, %s546_s29 }
  0x30   : > { %p549_p11 = pnand %p547_p10, %p518_p13  ;;  %p555_p3 = scmp.lt.u32.totalorder %s546_s29, %s763_s4 }
  0x31   : > { %p554_p2 = por %p553_p0, %p552_p12 }
  0x32   : > { %p550_p8 = pneg %p549_p11 }
  0x33   : > { %p556_p4 = por %p555_p3, %p554_p2 }
  0x35   : > { %p557_p1 = pnand %p556_p4, %p550_p8 }
  0x37   : > { %560 = shalt.err (!%p557_p1)
}
  0x38   : > { %s561_s22 = scalar_lea.vmem %s189_s6, 128  ;;  %s633_s24 = smov [#allocation7]  }
  0x39   : > { %p562_p5 = scmp.ne.s32.totalorder %s189_s6, %s561_s22  ;;  %s566_s15 = sshll.u32 %s633_s24, 4  ;;  %s567_s15 = int_to_ptr.vmem [resolvable:$false] %s566_s15 }
  0x3a   : > { %s568_s17 = scalar_lea.vmem %s567_s15, 256  ;;  %p569_p7 = scmp.lt.s32.totalorder %s189_s6, %s567_s15 }
  0x3b   : > { %p564_p10 = pnand %p562_p5, %p518_p13  ;;  %p570_p6 = scmp.lt.s32.totalorder %s568_s17, %s561_s22 }
  0x3d   : > { %p565_p11 = pneg %p564_p10  ;;  %p571_p0 = por %p570_p6, %p569_p7 }
  0x3f   : > { %p572_p12 = pnand %p571_p0, %p565_p11 }
  0x41   : > { %575 = shalt.err (!%p572_p12)
}
  0x42   : > { %460 = dma.hbm_to_vmem [thread:$0]  (!%p716_p9), %s763_s4, 128, %s189_s6, %s174_s27  }
  0x43   : > { %p831_p8 = scmp.ne.s32.totalorder %s830_s25, 0 }
  0x44   : > { %s199_s18 = sand.u32 (!%p831_p8), 1, %s614_s10   ;;  %p832_p13 = scmp.ne.s32.totalorder (!%p831_p8), %s826_s20, 0 }
  0x45   : > { %197 = sbr.rel (%p831_p8) target bundleno = 129 (0x81), region = 28  ;;  %s445_s19 = sshll.u32 (!%p831_p8), %s199_s18, 3 }
  0x46   : > { %s200_s26 = scalar_lea.sflag (!%p831_p8), [#allocation6], %s199_s18  ;;  %s203_s28 = scalar_lea.vmem (!%p831_p8), [#allocation5], %s445_s19 }
  0x4c   : > { %601 = dma.done.wait (%p832_p13), %s200_s26, 128  }
  0x4d   : > { %603 = vsyncadd (%p832_p13), %s200_s26, 4294967168  ;;  %s209_s5 = scalar_lea.sflag [#allocation8], %s199_s18  ;;  %s212_s29 = scalar_lea.vmem [#allocation7], %s445_s19 }
  0x4e   : > { %605 = dma.done.wait (%p832_p13), %s209_s5, 128  }
  0x4f   : > { %607 = vsyncadd (%p832_p13), %s209_s5, 4294967168  ;;  %v260_v0 = vld [vmem:[%s203_s28] sm:$0xff]  ;;  %v261_v7 = vld [vmem:[%s212_s29] sm:$0xff]  ;;  %p246_p7 = scmp.lt.s32.totalorder %s622_s12, 1 }
  0x50   : > { %v262_v1 = vand.u32 2147483647, %v260_v0  ;;  %v266_v9 = vmax.f32 %v260_v0, 0.0  ;;  %v267_v10 = vmul.f32 %v261_v7, %v260_v0  ;;  %vm281_vm1 = vcmp.ge.f32.partialorder %v260_v0, 0.0 }
  0x51   : > { %s841_s12 = smov (!%p246_p7, %s622_s12), 1 }
  0x52   : > { %v263_v2 = vsub.f32 0.0, %v262_v1  ;;  %v268_v14 = vsub.f32 %v266_v9, %v267_v10  ;;  %s447_s20 = sshll.u32 %s841_s12, 2 }
  0x53   : > { %s252_s4 = scalar_lea.vmem %s823_s2, %s447_s20 }
  0x54   : > { %v264_v3 = vmul.f32 1.442695, %v263_v2 }
  0x56   : > { %510 = vpow2.f32 %v264_v3 }
  0x60   : > { %v511_v4 = vpop.eup %510 }
  0x61   : > { %v269_v5 = vadd.f32 1.0, %v511_v4  ;;  %v272_v6 = vmul.f32 -0.5, %v511_v4  ;;  %v275_v11 = vand.u32 2147483647, %v511_v4 }
  0x63   : > { %512 = vlog2.f32 %v269_v5  ;;  %v273_v8 = vadd.f32 1.0, %v272_v6  ;;  %vm276_vm0 = vcmp.lt.f32.partialorder %v275_v11, 0.0004427343 }
  0x64   : > { %514 = vrcp.f32 %v269_v5 }
  0x65   : > { %v274_v12 = vmul.f32 %v511_v4, %v273_v8 }
  0x6d   : > { %v513_v13 = vpop.eup %512 }
  0x6e   : > { %v515_v15 = vpop.eup %514  ;;  %v271_v16 = vmul.f32 0.6931472, %v513_v13 }
  0x6f   : > { %v282_v17 = vmul.f32 %v515_v15, %v511_v4 }
  0x70   : > { %v277_v18 = vsel %vm276_vm0, %v274_v12, %v271_v16 }
  0x71   : > { %v278_v19 = vadd.f32 %v277_v18, %v268_v14  ;;  %v283_v20 = vsel %vm281_vm1, %v515_v15, %v282_v17 }
  0x72   : > { %v289_v21 = vmul.f32 %v283_v20, %v261_v7  ;;  %v294_v22 = vadd.f32 %v283_v20, %v261_v7 }
  0x73   : > { %v302_v23 = vrot.slane %v278_v19, 4 }
  0x74   : > { %v310_v24 = vrot.slane %v289_v21, 4  ;;  %v318_v25 = vrot.slane %v294_v22, 4 }
  0x75   : > { %v303_v26 = vadd.f32 %v302_v23, %v278_v19 }
  0x76   : > { %v311_v27 = vadd.f32 %v310_v24, %v289_v21  ;;  %v319_v28 = vadd.f32 %v318_v25, %v294_v22 }
  0x77   : > { %v304_v29 = vrot.slane %v303_v26, 2 }
  0x78   : > { %v312_v30 = vrot.slane %v311_v27, 2  ;;  %v320_v31 = vrot.slane %v319_v28, 2 }
  0x79   : > { %v305_v32 = vadd.f32 %v304_v29, %v303_v26 }
  0x7a   : > { %v313_v33 = vadd.f32 %v312_v30, %v311_v27  ;;  %v321_v34 = vadd.f32 %v320_v31, %v319_v28 }
  0x7b   : > { %v306_v35 = vrot.slane %v305_v32, 1 }
  0x7c   : > { %v314_v36 = vrot.slane %v313_v33, 1  ;;  %v322_v37 = vrot.slane %v321_v34, 1 }
  0x7d   : > { %v307_v38 = vadd.f32 %v306_v35, %v305_v32 }
  0x7e   : > { %v315_v39 = vadd.f32 %v314_v36, %v313_v33  ;;  %v323_v40 = vadd.f32 %v322_v37, %v321_v34 }
  0x7f   : > { %308 = vst [vmem:[%s252_s4] sm:$0x1] %v307_v38 }
  0x80   : > { %316 = vst [vmem:[%s252_s4 + $0x1] sm:$0x1] %v315_v39  ;;  %324 = vst [vmem:[%s252_s4 + $0x2] sm:$0x1] %v323_v40 }
  0x81 PF: > { %s18_s14 = sadd.s32 1, %s630_s14   ;;  %s833_s9 = smov %s614_s10 }
  0x82   : > { %p15_p9 = scmp.ge.s32.totalorder %s18_s14, 4   ;;  %s834_s10 = smov %s618_s11 }
  0x83   : > { %s835_s11 = smov %s698_s21  ;;  %s836_s12 = smov %s626_s13 }
  0x84   : > { %s837_s13 = smov %s839_s16  ;;  %17 = sbr.rel (!%p15_p9) target bundleno = 6 (0x6), region = 89 }
  0x8b   :  { %350 = vsyncpa [#allocation6], 1 }
  0x8c   :  { %352 = vsyncpa [#allocation6 + $0x1], 1 }
  0x8d   :  { %353 = vsyncpa [#allocation8], 1 }
  0x8e   :  { %355 = vsyncpa [#allocation8 + $0x1], 1 }

</bundles_post_ra>
